<compile_context>
chip_gen: v6e
topology: v6e:2x2x1
jax: 0.10.0
libtpu: 0.0.40
codegen_flags: <defaults>
</compile_context>

<pallas_src>
import functools
import math

import jax
import jax.numpy as jnp
from jax import lax
from jax.experimental import pallas as pl
from jax.experimental.pallas import tpu as pltpu


def encoder_kernel(vl_ref,                      # scalar prefetch: (B,) int32 (SMEM)
                   x_ref,                       # (BT*S, H) f32 row slab
                   wq_ref, bq_ref,              # (NH, H, DQ) bf16, (NH, 1, DQ) f32
                   wk_ref, bk_ref,              # (NH, H, DQ) bf16, (NH, 1, DQ) f32
                   wv_ref, bv_ref,              # (NH, H, DV) bf16, (NH, 1, DV) f32
                   wo_ref, bo_ref,              # (NH, DV, H) bf16, (1, H) f32
                   g1_ref, be1_ref,             # (1, H) f32 layernorm-1
                   w1_ref, b1_ref,              # (H, F) bf16, (1, F) f32
                   w2_ref, b2_ref,              # (F, H) bf16, (1, H) f32
                   g2_ref, be2_ref,             # (1, H) f32 layernorm-2
                   o_ref,                       # (BT*S, H)
                   *, num_heads, head_q, block_b, seq_len):
    NH, S, BT = num_heads, seq_len, block_b
    N = BT * S                 # fused row dim fed to every matmul
    G = NH * BT                # fused (head, batch) dim for the attention core
    i = pl.program_id(0)
    f32, bf16 = jnp.float32, jnp.bfloat16

    x_f32 = x_ref[...].astype(f32)                       # (N, H)
    x_bf = x_f32.astype(bf16)                            # MXU operand

    # One activation copy per head, hoisted once, so q/k/v are single *batched*
    # dot_generals (head is the batch dim): one MXU op stream, no per-head Python
    # loop, no jnp.stack relayout.
    xh = jnp.broadcast_to(x_bf[None], (NH, N, x_bf.shape[-1]))
    dn_head = (((2,), (1,)), ((0,), (0,)))               # contract feature, batch heads

    def proj(w_ref, b_ref):
        return lax.dot_general(xh, w_ref[...], dn_head,
                               preferred_element_type=f32) + b_ref[...]   # (NH, N, D)

    scale = jnp.float32(1.0 / math.sqrt(head_q))
    q = proj(wq_ref, bq_ref) * scale                     # scale folded into q once
    k = proj(wk_ref, bk_ref)
    v = proj(wv_ref, bv_ref)

    # (NH, N, D) -> (G, S, D): split the fused row dim per sequence (sublane-aligned
    # for f32), cast to bf16 after the split so no packed-tile boundary is crossed.
    q = q.reshape(G, S, -1).astype(bf16)
    k = k.reshape(G, S, -1).astype(bf16)
    v = v.reshape(G, S, -1).astype(bf16)

    # Additive key mask for the whole batch tile, built once (hoisted before all
    # matmuls) and shared across heads / query rows.
    col = lax.broadcasted_iota(jnp.int32, (1, 1, S), 2)
    mask_rows = [jnp.where(col < vl_ref[i * BT + b], 0.0, jnp.float32(-1e9))
                 for b in range(BT)]                      # BT tiny (1,1,S) selects
    bias_b = mask_rows[0] if BT == 1 else jnp.concatenate(mask_rows, axis=0)  # (BT,1,S)
    bias = jnp.broadcast_to(bias_b[None], (NH, BT, 1, S)).reshape(G, 1, S)

    # Batched attention core over g = head*BT + batch.
    s = jnp.einsum('gqd,gkd->gqk', q, k, preferred_element_type=f32) + bias  # (G,S,S)
    m = jnp.max(s, axis=-1, keepdims=True)
    e = jnp.exp(s - m)
    p = e * pl.reciprocal(jnp.sum(e, axis=-1, keepdims=True), approx=True)
    ob = jnp.einsum('gqk,gkd->gqd', p.astype(bf16), v,
                    preferred_element_type=f32)                              # (G,S,DV)

    # Output projection: one batched dot over heads against host-pre-split W_o rows,
    # then a single tree-sum over the small head axis. No per-head serial add chain,
    # no feature-axis concat of head outputs.
    o4 = ob.reshape(NH, N, -1).astype(bf16)                                  # (NH,N,DV)
    yh = lax.dot_general(o4, wo_ref[...], dn_head, preferred_element_type=f32)
    attn_out = jnp.sum(yh, axis=0) + bo_ref[...]                             # (N, H)

    def layernorm(z, g, be):
        mu = jnp.mean(z, axis=-1, keepdims=True)
        var = jnp.mean((z - mu) ** 2, axis=-1, keepdims=True)  # biased, like torch
        return (z - mu) * lax.rsqrt(var + 1e-5) * g + be

    # --- AddNorm 1 ---
    y1 = layernorm(x_f32 + attn_out, g1_ref[...], be1_ref[...])

    # --- position-wise FFN (bf16 operands, f32 accumulate) ---
    h1 = jnp.dot(y1.astype(bf16), w1_ref[...],
                 preferred_element_type=f32) + b1_ref[...]
    h1 = jnp.maximum(h1, 0.0)
    y2 = jnp.dot(h1.astype(bf16), w2_ref[...],
                 preferred_element_type=f32) + b2_ref[...]

    # --- AddNorm 2 ---
    out = layernorm(y1 + y2, g2_ref[...], be2_ref[...])
    o_ref[...] = out.astype(o_ref.dtype)


def transformer_encoder(x, valid_lens, params, *, num_heads, head_q, head_v,
                        block_b=1):
    B, S, H = x.shape
    assert B % block_b == 0, "block_b must divide the batch size"
    NH, DQ, DV = num_heads, head_q, head_v
    F = params["w1"].shape[-1]
    bf16 = jnp.bfloat16

    # Host-side restructuring: per-head weight stacking + bf16 weight storage.
    wq3 = params["wq"].reshape(H, NH, DQ).transpose(1, 0, 2).astype(bf16)
    wk3 = params["wk"].reshape(H, NH, DQ).transpose(1, 0, 2).astype(bf16)
    wv3 = params["wv"].reshape(H, NH, DV).transpose(1, 0, 2).astype(bf16)
    wo3 = params["wo"].reshape(NH, DV, H).astype(bf16)
    bq3 = params["bq"].reshape(NH, 1, DQ)
    bk3 = params["bk"].reshape(NH, 1, DQ)
    bv3 = params["bv"].reshape(NH, 1, DV)
    w1 = params["w1"].astype(bf16)
    w2 = params["w2"].astype(bf16)

    param_list = [wq3, bq3, wk3, bk3, wv3, bv3, wo3, params["bo"],
                  params["g1"], params["be1"], w1, params["b1"],
                  w2, params["b2"], params["g2"], params["be2"]]

    # Constant weights: single resident VMEM copy, no per-step double buffering.
    vmem_spec = pl.BlockSpec(memory_space=pltpu.MemorySpace.VMEM)

    # Lane-dense (rows, H) activation slabs (store-density lever).
    x2 = x.reshape(B * S, H)
    rows = block_b * S
    in_specs = [pl.BlockSpec((rows, H), lambda i, vl: (i, 0))]
    in_specs += [vmem_spec] * len(param_list)

    grid_spec = pltpu.PrefetchScalarGridSpec(
        num_scalar_prefetch=1,
        grid=(B // block_b,),
        in_specs=in_specs,
        out_specs=pl.BlockSpec((rows, H), lambda i, vl: (i, 0)),
    )

    flops = 2 * B * S * H * NH * (2 * DQ + DV)            # q, k, v projections
    flops += 2 * B * NH * S * S * (DQ + DV)               # scores + p @ v
    flops += 2 * B * S * NH * DV * H                      # output projection
    flops += 4 * B * S * H * F                            # FFN (two matmuls)
    bytes_accessed = (2 * x.size * x.dtype.itemsize
                      + sum(int(p.size) * p.dtype.itemsize for p in param_list)
                      + valid_lens.size * valid_lens.dtype.itemsize)
    cost = pl.CostEstimate(flops=int(flops),
                           transcendentals=int(B * NH * S * S),
                           bytes_accessed=int(bytes_accessed))

    kernel = functools.partial(encoder_kernel, num_heads=NH, head_q=DQ,
                               block_b=block_b, seq_len=S)

    out2d = pl.pallas_call(
        kernel,
        out_shape=jax.ShapeDtypeStruct((B * S, H), x.dtype),
        grid_spec=grid_spec,
        compiler_params=pltpu.CompilerParams(
            dimension_semantics=("parallel",),
            # Explicit VMEM budget: above the 32 MiB scoped default, safely inside
            # v7x's 64 MiB physical VMEM (and trivially inside v5e/v6e's 128 MiB).
            vmem_limit_bytes=48 * 1024 * 1024),
        cost_estimate=cost,
    )(valid_lens, x2, *param_list)
    return out2d.reshape(B, S, H)


def reference_encoder(x, valid_lens, params, *, num_heads, head_q, head_v):
    """Pure-JAX reference mirroring the PyTorch forward (eval mode) using the
    same bf16-operand / f32-accumulate precision policy as the kernel."""
    B, S, H = x.shape
    bf16, f32 = jnp.bfloat16, jnp.float32

    def mm(a, w):
        return jnp.dot(a.astype(bf16), w.astype(bf16), preferred_element_type=f32)

    q = (mm(x, params["wq"]) + params["bq"]) * (1.0 / math.sqrt(head_q))
    k = mm(x, params["wk"]) + params["bk"]
    v = mm(x, params["wv"]) + params["bv"]
    q = q.reshape(B, S, num_heads, head_q).transpose(0, 2, 1, 3)
    k = k.reshape(B, S, num_heads, head_q).transpose(0, 2, 1, 3)
    v = v.reshape(B, S, num_heads, head_v).transpose(0, 2, 1, 3)
    attn = jnp.einsum("bhqd,bhkd->bhqk", q.astype(bf16), k.astype(bf16),
                      preferred_element_type=f32)
    keep = jnp.arange(S)[None, None, None, :] < valid_lens[:, None, None, None]
    attn = jnp.where(keep, attn, -1e9)
    attn = jax.nn.softmax(attn, axis=-1)
    out = jnp.einsum("bhqk,bhkd->bhqd", attn.astype(bf16), v.astype(bf16),
                     preferred_element_type=f32)
    out = out.transpose(0, 2, 1, 3).reshape(B, S, -1)
    y = mm(out, params["wo"]) + params["bo"]

    def ln(z, g, be):
        mu = jnp.mean(z, axis=-1, keepdims=True)
        var = jnp.mean((z - mu) ** 2, axis=-1, keepdims=True)
        return (z - mu) / jnp.sqrt(var + 1e-5) * g + be

    y1 = ln(x + y, params["g1"], params["be1"])
    h1 = jnp.maximum(mm(y1, params["w1"]) + params["b1"], 0.0)
    y2 = mm(h1, params["w2"]) + params["b2"]
    return ln(y1 + y2, params["g2"], params["be2"])


def init_params(key, hidden, q_size, k_size, v_size, num_heads, ffn_hidden):
    ks = jax.random.split(key, 12)
    s = 0.1

    def lin(kw, kb, din, dout):
        return (s * jax.random.normal(kw, (din, dout), jnp.float32),
                s * jax.random.normal(kb, (1, dout), jnp.float32))

    wq, bq = lin(ks[0], ks[1], hidden, q_size * num_heads)
    wk, bk = lin(ks[2], ks[3], hidden, k_size * num_heads)
    wv, bv = lin(ks[4], ks[5], hidden, v_size * num_heads)
    wo, bo = lin(ks[6], ks[7], num_heads * v_size, hidden)
    w1, b1 = lin(ks[8], ks[9], hidden, ffn_hidden)
    w2, b2 = lin(ks[10], ks[11], ffn_hidden, hidden)
    return {
        "wq": wq, "bq": bq, "wk": wk, "bk": bk, "wv": wv, "bv": bv,
        "wo": wo, "bo": bo,
        "g1": jnp.ones((1, hidden), jnp.float32), "be1": jnp.zeros((1, hidden), jnp.float32),
        "w1": w1, "b1": b1, "w2": w2, "b2": b2,
        "g2": jnp.ones((1, hidden), jnp.float32), "be2": jnp.zeros((1, hidden), jnp.float32),
    }


if __name__ == "__main__":
    B, S, H = 2, 8, 32
    num_heads = 2
    q_size = k_size = v_size = H          # matches the reference reshape semantics
    ffn_hidden = 64

    key = jax.random.PRNGKey(0)
    kx, kp = jax.random.split(key)
    x = jax.random.normal(kx, (B, S, H), jnp.float32)
    valid_lens = jnp.array([5, 8], dtype=jnp.int32)
    params = init_params(kp, H, q_size, k_size, v_size, num_heads, ffn_hidden)

    ref = reference_encoder(x, valid_lens, params,
                            num_heads=num_heads, head_q=q_size, head_v=v_size)

    # block_b=1: grid of 2 -> "parallel" axis can shard across both v7x TensorCores.
    out1 = jax.block_until_ready(transformer_encoder(
        x, valid_lens, params, num_heads=num_heads, head_q=q_size,
        head_v=v_size, block_b=1))
    # block_b=B: whole batch per step -> amortizes per-step overhead on 1-TC chips.
    # (At real sizes pick block_b so block_b*S >= 128 on v5e / 256 on v6e-v7x.)
    out2 = jax.block_until_ready(transformer_encoder(
        x, valid_lens, params, num_heads=num_heads, head_q=q_size,
        head_v=v_size, block_b=B))

    assert out1.shape == (B, S, H)
    assert jnp.max(jnp.abs(out1 - ref)) < 2e-2, "mismatch vs reference (block_b=1)"
    assert jnp.max(jnp.abs(out2 - ref)) < 2e-2, "mismatch vs reference (block_b=B)"
    assert jnp.max(jnp.abs(out1 - out2)) < 1e-5, "block_b paths disagree"

    print("KERNEL_OK")
</pallas_src>

<mosaic_0001>
module attributes {stable_mosaic.version = 11 : i64} {
  func.func @encoder_kernel(%arg0: i32, %arg1: memref<2xi32, #tpu.memory_space<smem>>, %arg2: memref<8x32xf32, #tpu.memory_space<vmem>>, %arg3: memref<2x32x32xbf16, #tpu.memory_space<vmem>>, %arg4: memref<2x1x32xf32, #tpu.memory_space<vmem>>, %arg5: memref<2x32x32xbf16, #tpu.memory_space<vmem>>, %arg6: memref<2x1x32xf32, #tpu.memory_space<vmem>>, %arg7: memref<2x32x32xbf16, #tpu.memory_space<vmem>>, %arg8: memref<2x1x32xf32, #tpu.memory_space<vmem>>, %arg9: memref<2x32x32xbf16, #tpu.memory_space<vmem>>, %arg10: memref<1x32xf32, #tpu.memory_space<vmem>>, %arg11: memref<1x32xf32, #tpu.memory_space<vmem>>, %arg12: memref<1x32xf32, #tpu.memory_space<vmem>>, %arg13: memref<32x64xbf16, #tpu.memory_space<vmem>>, %arg14: memref<1x64xf32, #tpu.memory_space<vmem>>, %arg15: memref<64x32xbf16, #tpu.memory_space<vmem>>, %arg16: memref<1x32xf32, #tpu.memory_space<vmem>>, %arg17: memref<1x32xf32, #tpu.memory_space<vmem>>, %arg18: memref<1x32xf32, #tpu.memory_space<vmem>>, %arg19: memref<8x32xf32, #tpu.memory_space<vmem>>) attributes {dimension_semantics = [#tpu.dimension_semantics<parallel>], iteration_bounds = array<i64: 2>, scalar_prefetch = 1 : i64, scratch_operands = 0 : i64, tpu.core_type = #tpu.core_type<tc>, window_params = [{transform_indices = @transform_0, window_bounds = array<i64: 8, 32>}, {pipeline_mode = #tpu.pipeline_mode<synchronous>, transform_indices = @transform_1, window_bounds = array<i64: 2, 32, 32>}, {pipeline_mode = #tpu.pipeline_mode<synchronous>, transform_indices = @transform_2, window_bounds = array<i64: 2, 1, 32>}, {pipeline_mode = #tpu.pipeline_mode<synchronous>, transform_indices = @transform_3, window_bounds = array<i64: 2, 32, 32>}, {pipeline_mode = #tpu.pipeline_mode<synchronous>, transform_indices = @transform_4, window_bounds = array<i64: 2, 1, 32>}, {pipeline_mode = #tpu.pipeline_mode<synchronous>, transform_indices = @transform_5, window_bounds = array<i64: 2, 32, 32>}, {pipeline_mode = #tpu.pipeline_mode<synchronous>, transform_indices = @transform_6, window_bounds = array<i64: 2, 1, 32>}, {pipeline_mode = #tpu.pipeline_mode<synchronous>, transform_indices = @transform_7, window_bounds = array<i64: 2, 32, 32>}, {pipeline_mode = #tpu.pipeline_mode<synchronous>, transform_indices = @transform_8, window_bounds = array<i64: 1, 32>}, {pipeline_mode = #tpu.pipeline_mode<synchronous>, transform_indices = @transform_9, window_bounds = array<i64: 1, 32>}, {pipeline_mode = #tpu.pipeline_mode<synchronous>, transform_indices = @transform_10, window_bounds = array<i64: 1, 32>}, {pipeline_mode = #tpu.pipeline_mode<synchronous>, transform_indices = @transform_11, window_bounds = array<i64: 32, 64>}, {pipeline_mode = #tpu.pipeline_mode<synchronous>, transform_indices = @transform_12, window_bounds = array<i64: 1, 64>}, {pipeline_mode = #tpu.pipeline_mode<synchronous>, transform_indices = @transform_13, window_bounds = array<i64: 64, 32>}, {pipeline_mode = #tpu.pipeline_mode<synchronous>, transform_indices = @transform_14, window_bounds = array<i64: 1, 32>}, {pipeline_mode = #tpu.pipeline_mode<synchronous>, transform_indices = @transform_15, window_bounds = array<i64: 1, 32>}, {pipeline_mode = #tpu.pipeline_mode<synchronous>, transform_indices = @transform_16, window_bounds = array<i64: 1, 32>}, {transform_indices = @transform_17, window_bounds = array<i64: 8, 32>}]} {
    %c0 = arith.constant 0 : index
    %c0_0 = arith.constant 0 : index
    %0 = vector.load %arg2[%c0, %c0_0] : memref<8x32xf32, #tpu.memory_space<vmem>>, vector<8x32xf32>
    %1 = arith.truncf %0 : vector<8x32xf32> to vector<8x32xbf16>
    %2 = vector.shape_cast %1 : vector<8x32xbf16> to vector<1x8x32xbf16>
    %3 = vector.shape_cast %2 : vector<1x8x32xbf16> to vector<1x8x32xbf16>
    %4 = vector.broadcast %3 : vector<1x8x32xbf16> to vector<2x8x32xbf16>
    %c0_1 = arith.constant 0 : index
    %c0_2 = arith.constant 0 : index
    %c0_3 = arith.constant 0 : index
    %5 = vector.load %arg3[%c0_1, %c0_2, %c0_3] : memref<2x32x32xbf16, #tpu.memory_space<vmem>>, vector<2x32x32xbf16>
    %cst = arith.constant dense<0.000000e+00> : vector<2x8x32xf32>
    %6 = tpu.matmul %4, %5, %cst {dimension_numbers = #tpu.dot_dimension_numbers<[2], [1], [1], [2], [0, 0, 0, 1, 1, 2], [0], [0]>} : vector<2x8x32xbf16>, vector<2x32x32xbf16>, vector<2x8x32xf32> -> vector<2x8x32xf32>
    %c0_4 = arith.constant 0 : index
    %c0_5 = arith.constant 0 : index
    %c0_6 = arith.constant 0 : index
    %7 = vector.load %arg4[%c0_4, %c0_5, %c0_6] : memref<2x1x32xf32, #tpu.memory_space<vmem>>, vector<2x1x32xf32>
    %8 = vector.broadcast %7 : vector<2x1x32xf32> to vector<2x8x32xf32>
    %9 = arith.addf %6, %8 : vector<2x8x32xf32>
    %cst_7 = arith.constant 0.176776692 : f32
    %10 = vector.broadcast %cst_7 : f32 to vector<2x8x32xf32>
    %11 = arith.mulf %9, %10 : vector<2x8x32xf32>
    %c0_8 = arith.constant 0 : index
    %c0_9 = arith.constant 0 : index
    %c0_10 = arith.constant 0 : index
    %12 = vector.load %arg5[%c0_8, %c0_9, %c0_10] : memref<2x32x32xbf16, #tpu.memory_space<vmem>>, vector<2x32x32xbf16>
    %cst_11 = arith.constant dense<0.000000e+00> : vector<2x8x32xf32>
    %13 = tpu.matmul %4, %12, %cst_11 {dimension_numbers = #tpu.dot_dimension_numbers<[2], [1], [1], [2], [0, 0, 0, 1, 1, 2], [0], [0]>} : vector<2x8x32xbf16>, vector<2x32x32xbf16>, vector<2x8x32xf32> -> vector<2x8x32xf32>
    %c0_12 = arith.constant 0 : index
    %c0_13 = arith.constant 0 : index
    %c0_14 = arith.constant 0 : index
    %14 = vector.load %arg6[%c0_12, %c0_13, %c0_14] : memref<2x1x32xf32, #tpu.memory_space<vmem>>, vector<2x1x32xf32>
    %15 = vector.broadcast %14 : vector<2x1x32xf32> to vector<2x8x32xf32>
    %16 = arith.addf %13, %15 : vector<2x8x32xf32>
    %c0_15 = arith.constant 0 : index
    %c0_16 = arith.constant 0 : index
    %c0_17 = arith.constant 0 : index
    %17 = vector.load %arg7[%c0_15, %c0_16, %c0_17] : memref<2x32x32xbf16, #tpu.memory_space<vmem>>, vector<2x32x32xbf16>
    %cst_18 = arith.constant dense<0.000000e+00> : vector<2x8x32xf32>
    %18 = tpu.matmul %4, %17, %cst_18 {dimension_numbers = #tpu.dot_dimension_numbers<[2], [1], [1], [2], [0, 0, 0, 1, 1, 2], [0], [0]>} : vector<2x8x32xbf16>, vector<2x32x32xbf16>, vector<2x8x32xf32> -> vector<2x8x32xf32>
    %c0_19 = arith.constant 0 : index
    %c0_20 = arith.constant 0 : index
    %c0_21 = arith.constant 0 : index
    %19 = vector.load %arg8[%c0_19, %c0_20, %c0_21] : memref<2x1x32xf32, #tpu.memory_space<vmem>>, vector<2x1x32xf32>
    %20 = vector.broadcast %19 : vector<2x1x32xf32> to vector<2x8x32xf32>
    %21 = arith.addf %18, %20 : vector<2x8x32xf32>
    %22 = arith.truncf %11 : vector<2x8x32xf32> to vector<2x8x32xbf16>
    %23 = arith.truncf %16 : vector<2x8x32xf32> to vector<2x8x32xbf16>
    %24 = arith.truncf %21 : vector<2x8x32xf32> to vector<2x8x32xbf16>
    %25 = tpu.iota {dimensions = array<i32: 2>} : vector<1x1x8xi32>
    %c1_i32 = arith.constant 1 : i32
    %26 = arith.muli %arg0, %c1_i32 : i32
    %c0_i32 = arith.constant 0 : i32
    %27 = arith.addi %26, %c0_i32 : i32
    %28 = arith.index_cast %27 : i32 to index
    %29 = memref.load %arg1[%28] : memref<2xi32, #tpu.memory_space<smem>>
    %30 = vector.broadcast %29 : i32 to vector<1x1x8xi32>
    %31 = arith.cmpi slt, %25, %30 : vector<1x1x8xi32>
    %cst_22 = arith.constant 0.000000e+00 : f32
    %cst_23 = arith.constant -1.000000e+09 : f32
    %32 = vector.broadcast %cst_22 : f32 to vector<1x1x8xf32>
    %33 = vector.broadcast %cst_23 : f32 to vector<1x1x8xf32>
    %34 = arith.select %31, %32, %33 : vector<1x1x8xi1>, vector<1x1x8xf32>
    %35 = vector.shape_cast %34 : vector<1x1x8xf32> to vector<1x1x1x8xf32>
    %36 = vector.shape_cast %35 : vector<1x1x1x8xf32> to vector<1x1x1x8xf32>
    %37 = vector.broadcast %36 : vector<1x1x1x8xf32> to vector<2x1x1x8xf32>
    %38 = vector.shape_cast %37 : vector<2x1x1x8xf32> to vector<2x1x8xf32>
    "tpu.trace_start"() <{level = 10 : i32, message = "gqd,gkd->gqk"}> : () -> ()
    %cst_24 = arith.constant dense<0.000000e+00> : vector<2x8x8xf32>
    %39 = tpu.matmul %22, %23, %cst_24 {dimension_numbers = #tpu.dot_dimension_numbers<[2], [2], [1], [1], [0, 0, 0, 1, 1, 1], [0], [0]>} : vector<2x8x32xbf16>, vector<2x8x32xbf16>, vector<2x8x8xf32> -> vector<2x8x8xf32>
    "tpu.trace_stop"() : () -> ()
    %40 = vector.broadcast %38 : vector<2x1x8xf32> to vector<2x8x8xf32>
    %41 = arith.addf %39, %40 : vector<2x8x8xf32>
    %cst_25 = arith.constant dense<0xFF800000> : vector<2x8xf32>
    %42 = vector.multi_reduction <maximumf>, %41, %cst_25 [2] : vector<2x8x8xf32> to vector<2x8xf32>
    %43 = vector.shape_cast %42 : vector<2x8xf32> to vector<2x8x1xf32>
    %44 = vector.broadcast %43 : vector<2x8x1xf32> to vector<2x8x8xf32>
    %45 = arith.subf %41, %44 : vector<2x8x8xf32>
    %46 = math.exp %45 : vector<2x8x8xf32>
    %cst_26 = arith.constant dense<0.000000e+00> : vector<2x8xf32>
    %47 = vector.multi_reduction <add>, %46, %cst_26 [2] : vector<2x8x8xf32> to vector<2x8xf32>
    %48 = vector.shape_cast %47 : vector<2x8xf32> to vector<2x8x1xf32>
    %49 = tpu.reciprocal %48 {approx = true} : vector<2x8x1xf32> -> vector<2x8x1xf32>
    %50 = vector.broadcast %49 : vector<2x8x1xf32> to vector<2x8x8xf32>
    %51 = arith.mulf %46, %50 : vector<2x8x8xf32>
    %52 = arith.truncf %51 : vector<2x8x8xf32> to vector<2x8x8xbf16>
    "tpu.trace_start"() <{level = 10 : i32, message = "gqk,gkd->gqd"}> : () -> ()
    %cst_27 = arith.constant dense<0.000000e+00> : vector<2x8x32xf32>
    %53 = tpu.matmul %52, %24, %cst_27 {dimension_numbers = #tpu.dot_dimension_numbers<[2], [1], [1], [2], [0, 0, 0, 1, 1, 2], [0], [0]>} : vector<2x8x8xbf16>, vector<2x8x32xbf16>, vector<2x8x32xf32> -> vector<2x8x32xf32>
    "tpu.trace_stop"() : () -> ()
    %54 = arith.truncf %53 : vector<2x8x32xf32> to vector<2x8x32xbf16>
    %c0_28 = arith.constant 0 : index
    %c0_29 = arith.constant 0 : index
    %c0_30 = arith.constant 0 : index
    %55 = vector.load %arg9[%c0_28, %c0_29, %c0_30] : memref<2x32x32xbf16, #tpu.memory_space<vmem>>, vector<2x32x32xbf16>
    %cst_31 = arith.constant dense<0.000000e+00> : vector<2x8x32xf32>
    %56 = tpu.matmul %54, %55, %cst_31 {dimension_numbers = #tpu.dot_dimension_numbers<[2], [1], [1], [2], [0, 0, 0, 1, 1, 2], [0], [0]>} : vector<2x8x32xbf16>, vector<2x32x32xbf16>, vector<2x8x32xf32> -> vector<2x8x32xf32>
    %cst_32 = arith.constant dense<0.000000e+00> : vector<8x32xf32>
    %57 = vector.multi_reduction <add>, %56, %cst_32 [0] : vector<2x8x32xf32> to vector<8x32xf32>
    %c0_33 = arith.constant 0 : index
    %c0_34 = arith.constant 0 : index
    %58 = vector.load %arg10[%c0_33, %c0_34] : memref<1x32xf32, #tpu.memory_space<vmem>>, vector<1x32xf32>
    %59 = vector.broadcast %58 : vector<1x32xf32> to vector<8x32xf32>
    %60 = arith.addf %57, %59 : vector<8x32xf32>
    %61 = arith.addf %0, %60 : vector<8x32xf32>
    %c0_35 = arith.constant 0 : index
    %c0_36 = arith.constant 0 : index
    %62 = vector.load %arg11[%c0_35, %c0_36] : memref<1x32xf32, #tpu.memory_space<vmem>>, vector<1x32xf32>
    %c0_37 = arith.constant 0 : index
    %c0_38 = arith.constant 0 : index
    %63 = vector.load %arg12[%c0_37, %c0_38] : memref<1x32xf32, #tpu.memory_space<vmem>>, vector<1x32xf32>
    %cst_39 = arith.constant dense<0.000000e+00> : vector<8xf32>
    %64 = vector.multi_reduction <add>, %61, %cst_39 [1] : vector<8x32xf32> to vector<8xf32>
    %65 = vector.shape_cast %64 : vector<8xf32> to vector<8x1xf32>
    %cst_40 = arith.constant 3.200000e+01 : f32
    %66 = vector.broadcast %cst_40 : f32 to vector<8x1xf32>
    %67 = arith.divf %65, %66 : vector<8x1xf32>
    %68 = vector.broadcast %67 : vector<8x1xf32> to vector<8x32xf32>
    %69 = arith.subf %61, %68 : vector<8x32xf32>
    %70 = arith.mulf %69, %69 : vector<8x32xf32>
    %cst_41 = arith.constant dense<0.000000e+00> : vector<8xf32>
    %71 = vector.multi_reduction <add>, %70, %cst_41 [1] : vector<8x32xf32> to vector<8xf32>
    %72 = vector.shape_cast %71 : vector<8xf32> to vector<8x1xf32>
    %cst_42 = arith.constant 3.200000e+01 : f32
    %73 = vector.broadcast %cst_42 : f32 to vector<8x1xf32>
    %74 = arith.divf %72, %73 : vector<8x1xf32>
    %75 = vector.broadcast %67 : vector<8x1xf32> to vector<8x32xf32>
    %76 = arith.subf %61, %75 : vector<8x32xf32>
    %cst_43 = arith.constant 9.99999974E-6 : f32
    %77 = vector.broadcast %cst_43 : f32 to vector<8x1xf32>
    %78 = arith.addf %74, %77 : vector<8x1xf32>
    %79 = math.rsqrt %78 : vector<8x1xf32>
    %80 = vector.broadcast %79 : vector<8x1xf32> to vector<8x32xf32>
    %81 = arith.mulf %76, %80 : vector<8x32xf32>
    %82 = vector.broadcast %62 : vector<1x32xf32> to vector<8x32xf32>
    %83 = arith.mulf %81, %82 : vector<8x32xf32>
    %84 = vector.broadcast %63 : vector<1x32xf32> to vector<8x32xf32>
    %85 = arith.addf %83, %84 : vector<8x32xf32>
    %86 = arith.truncf %85 : vector<8x32xf32> to vector<8x32xbf16>
    %c0_44 = arith.constant 0 : index
    %c0_45 = arith.constant 0 : index
    %87 = vector.load %arg13[%c0_44, %c0_45] : memref<32x64xbf16, #tpu.memory_space<vmem>>, vector<32x64xbf16>
    %cst_46 = arith.constant dense<0.000000e+00> : vector<8x64xf32>
    %88 = tpu.matmul %86, %87, %cst_46 {dimension_numbers = #tpu.dot_dimension_numbers<[1], [0], [0], [1], [0, 0, 1, 1], [], []>} : vector<8x32xbf16>, vector<32x64xbf16>, vector<8x64xf32> -> vector<8x64xf32>
    %c0_47 = arith.constant 0 : index
    %c0_48 = arith.constant 0 : index
    %89 = vector.load %arg14[%c0_47, %c0_48] : memref<1x64xf32, #tpu.memory_space<vmem>>, vector<1x64xf32>
    %90 = vector.broadcast %89 : vector<1x64xf32> to vector<8x64xf32>
    %91 = arith.addf %88, %90 : vector<8x64xf32>
    %cst_49 = arith.constant 0.000000e+00 : f32
    %92 = vector.broadcast %cst_49 : f32 to vector<8x64xf32>
    %93 = arith.maximumf %91, %92 : vector<8x64xf32>
    %94 = arith.truncf %93 : vector<8x64xf32> to vector<8x64xbf16>
    %c0_50 = arith.constant 0 : index
    %c0_51 = arith.constant 0 : index
    %95 = vector.load %arg15[%c0_50, %c0_51] : memref<64x32xbf16, #tpu.memory_space<vmem>>, vector<64x32xbf16>
    %cst_52 = arith.constant dense<0.000000e+00> : vector<8x32xf32>
    %96 = tpu.matmul %94, %95, %cst_52 {dimension_numbers = #tpu.dot_dimension_numbers<[1], [0], [0], [1], [0, 0, 1, 1], [], []>} : vector<8x64xbf16>, vector<64x32xbf16>, vector<8x32xf32> -> vector<8x32xf32>
    %c0_53 = arith.constant 0 : index
    %c0_54 = arith.constant 0 : index
    %97 = vector.load %arg16[%c0_53, %c0_54] : memref<1x32xf32, #tpu.memory_space<vmem>>, vector<1x32xf32>
    %98 = vector.broadcast %97 : vector<1x32xf32> to vector<8x32xf32>
    %99 = arith.addf %96, %98 : vector<8x32xf32>
    %100 = arith.addf %85, %99 : vector<8x32xf32>
    %c0_55 = arith.constant 0 : index
    %c0_56 = arith.constant 0 : index
    %101 = vector.load %arg17[%c0_55, %c0_56] : memref<1x32xf32, #tpu.memory_space<vmem>>, vector<1x32xf32>
    %c0_57 = arith.constant 0 : index
    %c0_58 = arith.constant 0 : index
    %102 = vector.load %arg18[%c0_57, %c0_58] : memref<1x32xf32, #tpu.memory_space<vmem>>, vector<1x32xf32>
    %cst_59 = arith.constant dense<0.000000e+00> : vector<8xf32>
    %103 = vector.multi_reduction <add>, %100, %cst_59 [1] : vector<8x32xf32> to vector<8xf32>
    %104 = vector.shape_cast %103 : vector<8xf32> to vector<8x1xf32>
    %cst_60 = arith.constant 3.200000e+01 : f32
    %105 = vector.broadcast %cst_60 : f32 to vector<8x1xf32>
    %106 = arith.divf %104, %105 : vector<8x1xf32>
    %107 = vector.broadcast %106 : vector<8x1xf32> to vector<8x32xf32>
    %108 = arith.subf %100, %107 : vector<8x32xf32>
    %109 = arith.mulf %108, %108 : vector<8x32xf32>
    %cst_61 = arith.constant dense<0.000000e+00> : vector<8xf32>
    %110 = vector.multi_reduction <add>, %109, %cst_61 [1] : vector<8x32xf32> to vector<8xf32>
    %111 = vector.shape_cast %110 : vector<8xf32> to vector<8x1xf32>
    %cst_62 = arith.constant 3.200000e+01 : f32
    %112 = vector.broadcast %cst_62 : f32 to vector<8x1xf32>
    %113 = arith.divf %111, %112 : vector<8x1xf32>
    %114 = vector.broadcast %106 : vector<8x1xf32> to vector<8x32xf32>
    %115 = arith.subf %100, %114 : vector<8x32xf32>
    %cst_63 = arith.constant 9.99999974E-6 : f32
    %116 = vector.broadcast %cst_63 : f32 to vector<8x1xf32>
    %117 = arith.addf %113, %116 : vector<8x1xf32>
    %118 = math.rsqrt %117 : vector<8x1xf32>
    %119 = vector.broadcast %118 : vector<8x1xf32> to vector<8x32xf32>
    %120 = arith.mulf %115, %119 : vector<8x32xf32>
    %121 = vector.broadcast %101 : vector<1x32xf32> to vector<8x32xf32>
    %122 = arith.mulf %120, %121 : vector<8x32xf32>
    %123 = vector.broadcast %102 : vector<1x32xf32> to vector<8x32xf32>
    %124 = arith.addf %122, %123 : vector<8x32xf32>
    %c0_64 = arith.constant 0 : index
    %c0_65 = arith.constant 0 : index
    %125 = vector.load %arg19[%c0_64, %c0_65] : memref<8x32xf32, #tpu.memory_space<vmem>>, vector<8x32xf32>
    tpu.vector_store %arg19[%c0_64, %c0_65], %124 {strides = array<i32>} : memref<8x32xf32, #tpu.memory_space<vmem>>, vector<8x32xf32>,
    return
  }
  func.func @transform_0(%arg0: i32, %arg1: memref<2xi32, #tpu.memory_space<smem>>) -> (i32, i32) {
    %c0_i32 = arith.constant 0 : i32
    %c0_i32_0 = arith.constant 0 : i32
    return %arg0, %c0_i32 : i32, i32
  }
  func.func @transform_1(%arg0: i32, %arg1: memref<2xi32, #tpu.memory_space<smem>>) -> (i32, i32, i32) {
    %c0_i32 = arith.constant 0 : i32
    %c0_i32_0 = arith.constant 0 : i32
    %c0_i32_1 = arith.constant 0 : i32
    %c0_i32_2 = arith.constant 0 : i32
    return %c0_i32, %c0_i32_0, %c0_i32_1 : i32, i32, i32
  }
  func.func @transform_2(%arg0: i32, %arg1: memref<2xi32, #tpu.memory_space<smem>>) -> (i32, i32, i32) {
    %c0_i32 = arith.constant 0 : i32
    %c0_i32_0 = arith.constant 0 : i32
    %c0_i32_1 = arith.constant 0 : i32
    %c0_i32_2 = arith.constant 0 : i32
    return %c0_i32, %c0_i32_0, %c0_i32_1 : i32, i32, i32
  }
  func.func @transform_3(%arg0: i32, %arg1: memref<2xi32, #tpu.memory_space<smem>>) -> (i32, i32, i32) {
    %c0_i32 = arith.constant 0 : i32
    %c0_i32_0 = arith.constant 0 : i32
    %c0_i32_1 = arith.constant 0 : i32
    %c0_i32_2 = arith.constant 0 : i32
    return %c0_i32, %c0_i32_0, %c0_i32_1 : i32, i32, i32
  }
  func.func @transform_4(%arg0: i32, %arg1: memref<2xi32, #tpu.memory_space<smem>>) -> (i32, i32, i32) {
    %c0_i32 = arith.constant 0 : i32
    %c0_i32_0 = arith.constant 0 : i32
    %c0_i32_1 = arith.constant 0 : i32
    %c0_i32_2 = arith.constant 0 : i32
    return %c0_i32, %c0_i32_0, %c0_i32_1 : i32, i32, i32
  }
  func.func @transform_5(%arg0: i32, %arg1: memref<2xi32, #tpu.memory_space<smem>>) -> (i32, i32, i32) {
    %c0_i32 = arith.constant 0 : i32
    %c0_i32_0 = arith.constant 0 : i32
    %c0_i32_1 = arith.constant 0 : i32
    %c0_i32_2 = arith.constant 0 : i32
    return %c0_i32, %c0_i32_0, %c0_i32_1 : i32, i32, i32
  }
  func.func @transform_6(%arg0: i32, %arg1: memref<2xi32, #tpu.memory_space<smem>>) -> (i32, i32, i32) {
    %c0_i32 = arith.constant 0 : i32
    %c0_i32_0 = arith.constant 0 : i32
    %c0_i32_1 = arith.constant 0 : i32
    %c0_i32_2 = arith.constant 0 : i32
    return %c0_i32, %c0_i32_0, %c0_i32_1 : i32, i32, i32
  }
  func.func @transform_7(%arg0: i32, %arg1: memref<2xi32, #tpu.memory_space<smem>>) -> (i32, i32, i32) {
    %c0_i32 = arith.constant 0 : i32
    %c0_i32_0 = arith.constant 0 : i32
    %c0_i32_1 = arith.constant 0 : i32
    %c0_i32_2 = arith.constant 0 : i32
    return %c0_i32, %c0_i32_0, %c0_i32_1 : i32, i32, i32
  }
  func.func @transform_8(%arg0: i32, %arg1: memref<2xi32, #tpu.memory_space<smem>>) -> (i32, i32) {
    %c0_i32 = arith.constant 0 : i32
    %c0_i32_0 = arith.constant 0 : i32
    %c0_i32_1 = arith.constant 0 : i32
    return %c0_i32, %c0_i32_0 : i32, i32
  }
  func.func @transform_9(%arg0: i32, %arg1: memref<2xi32, #tpu.memory_space<smem>>) -> (i32, i32) {
    %c0_i32 = arith.constant 0 : i32
    %c0_i32_0 = arith.constant 0 : i32
    %c0_i32_1 = arith.constant 0 : i32
    return %c0_i32, %c0_i32_0 : i32, i32
  }
  func.func @transform_10(%arg0: i32, %arg1: memref<2xi32, #tpu.memory_space<smem>>) -> (i32, i32) {
    %c0_i32 = arith.constant 0 : i32
    %c0_i32_0 = arith.constant 0 : i32
    %c0_i32_1 = arith.constant 0 : i32
    return %c0_i32, %c0_i32_0 : i32, i32
  }
  func.func @transform_11(%arg0: i32, %arg1: memref<2xi32, #tpu.memory_space<smem>>) -> (i32, i32) {
    %c0_i32 = arith.constant 0 : i32
    %c0_i32_0 = arith.constant 0 : i32
    %c0_i32_1 = arith.constant 0 : i32
    return %c0_i32, %c0_i32_0 : i32, i32
  }
  func.func @transform_12(%arg0: i32, %arg1: memref<2xi32, #tpu.memory_space<smem>>) -> (i32, i32) {
    %c0_i32 = arith.constant 0 : i32
    %c0_i32_0 = arith.constant 0 : i32
    %c0_i32_1 = arith.constant 0 : i32
    return %c0_i32, %c0_i32_0 : i32, i32
  }
  func.func @transform_13(%arg0: i32, %arg1: memref<2xi32, #tpu.memory_space<smem>>) -> (i32, i32) {
    %c0_i32 = arith.constant 0 : i32
    %c0_i32_0 = arith.constant 0 : i32
    %c0_i32_1 = arith.constant 0 : i32
    return %c0_i32, %c0_i32_0 : i32, i32
  }
  func.func @transform_14(%arg0: i32, %arg1: memref<2xi32, #tpu.memory_space<smem>>) -> (i32, i32) {
    %c0_i32 = arith.constant 0 : i32
    %c0_i32_0 = arith.constant 0 : i32
    %c0_i32_1 = arith.constant 0 : i32
    return %c0_i32, %c0_i32_0 : i32, i32
  }
  func.func @transform_15(%arg0: i32, %arg1: memref<2xi32, #tpu.memory_space<smem>>) -> (i32, i32) {
    %c0_i32 = arith.constant 0 : i32
    %c0_i32_0 = arith.constant 0 : i32
    %c0_i32_1 = arith.constant 0 : i32
    return %c0_i32, %c0_i32_0 : i32, i32
  }
  func.func @transform_16(%arg0: i32, %arg1: memref<2xi32, #tpu.memory_space<smem>>) -> (i32, i32) {
    %c0_i32 = arith.constant 0 : i32
    %c0_i32_0 = arith.constant 0 : i32
    %c0_i32_1 = arith.constant 0 : i32
    return %c0_i32, %c0_i32_0 : i32, i32
  }
  func.func @transform_17(%arg0: i32, %arg1: memref<2xi32, #tpu.memory_space<smem>>) -> (i32, i32) {
    %c0_i32 = arith.constant 0 : i32
    %c0_i32_0 = arith.constant 0 : i32
    return %arg0, %c0_i32 : i32, i32
  }
}

</mosaic_0001>

<bundles_post_ra>
// kernel: tpu_custom_call.1
= control target key start
LH: loop header
LB: loop body
LE: loop exit
PB: predicated region body
PF: predicated region fallthrough
CT: control target
= control target key end

     0   :  { %s2388_s27 = smov [#allocation3]   ;;  %s2818_s0 = inlined_call_operand.hbm [shape: s32[2], index: 0, kind: input, shape index: {}]   ;;  %s2819_s1 = inlined_call_operand.vmem [shape: f32[16,32], index: 1, kind: input, shape index: {}]   ;;  %s2820_s2 = inlined_call_operand.vmem [shape: bf16[2,32,32], index: 2, kind: input, shape index: {}]   ;;  %s2821_s3 = inlined_call_operand.hbm [shape: f32[2,1,32], index: 3, kind: input, shape index: {}]   ;;  %s2822_s4 = inlined_call_operand.hbm [shape: bf16[2,32,32], index: 4, kind: input, shape index: {}]   ;;  %s2823_s5 = inlined_call_operand.hbm [shape: f32[2,1,32], index: 5, kind: input, shape index: {}]   ;;  %s2824_s6 = inlined_call_operand.hbm [shape: bf16[2,32,32], index: 6, kind: input, shape index: {}]   ;;  %s2825_s7 = inlined_call_operand.hbm [shape: f32[2,1,32], index: 7, kind: input, shape index: {}]   ;;  %s2826_s8 = inlined_call_operand.hbm [shape: bf16[2,32,32], index: 8, kind: input, shape index: {}]   ;;  %s2827_s9 = inlined_call_operand.hbm [shape: f32[1,32], index: 9, kind: input, shape index: {}]   ;;  %s2828_s10 = inlined_call_operand.vmem [shape: f32[1,32], index: 10, kind: input, shape index: {}]   ;;  %s2829_s11 = inlined_call_operand.vmem [shape: f32[1,32], index: 11, kind: input, shape index: {}]   ;;  %s2830_s12 = inlined_call_operand.vmem [shape: bf16[32,64], index: 12, kind: input, shape index: {}]   ;;  %s2831_s13 = inlined_call_operand.vmem [shape: f32[1,64], index: 13, kind: input, shape index: {}]   ;;  %s2832_s14 = inlined_call_operand.vmem [shape: bf16[64,32], index: 14, kind: input, shape index: {}]   ;;  %s2833_s15 = inlined_call_operand.vmem [shape: f32[1,32], index: 15, kind: input, shape index: {}]   ;;  %s2834_s16 = inlined_call_operand.vmem [shape: f32[1,32], index: 16, kind: input, shape index: {}]   ;;  %s2835_s17 = inlined_call_operand.vmem [shape: f32[1,32], index: 17, kind: input, shape index: {}]   ;;  %s2836_s18 = inlined_call_operand.hbm [shape: f32[16,32], index: 18, kind: output, shape index: {}]  }
   0x1   :  { %2847 = sst [smem:[#allocation29_spill]] %s2818_s0 }
   0x2   :  { %2848 = sst [smem:[#allocation30_spill]] %s2819_s1 }
   0x3   :  { %2849 = sst [smem:[#allocation31_spill]] %s2820_s2 }
   0x4   :  { %2850 = sst [smem:[#allocation32_spill]] %s2821_s3 }
   0x5   :  { %2851 = sst [smem:[#allocation33_spill]] %s2829_s11 }
   0x6   :  { %s2852_s11 = sld [smem:[#allocation29_spill]] }
   0xc   :  { %24 = dma.hbm_to_smem %s2852_s11, 16, %s2388_s27, [#allocation2] }
   0xd   :  { %2350 = dma.done.wait [#allocation2], 16 }
   0xe   :  { %2351 = vsyncadd [#allocation2], 4294967280 }
   0xf   :  { %26 = sfence }
  0x10   :  { %27 = vsyncpa [#allocation5], 0 }
  0x11   :  { %28 = vsyncpa [#allocation8], 0 }
  0x12   :  { %29 = vsyncpa [#allocation11], 0 }
  0x13   :  { %30 = vsyncpa [#allocation14], 0 }
  0x14   :  { %31 = vsyncpa [#allocation6], 0 }
  0x15   :  { %33 = vsyncpa [#allocation6 + $0x1], 0  ;;  %s2502_s30 = smov 0   ;;  %s2504_s0 = smov 0  }
  0x16   :  { %s2506_s19 = smov 0   ;;  %s2508_s1 = smov 0  }
  0x17 LB: > { %2853 = sst [smem:[#allocation23_spill]] %s2374_s30  ;;  %s2523_s11 = sadd.s32 4294967295, %s2386_s1   ;;  %s2386_s1 = sphi %s2508_s1, %s2882_s1   ;;  %s2382_s19 = sphi %s2506_s19, %s2884_s19   ;;  %s2378_s0 = sphi %s2504_s0, %s2886_s0   ;;  %s2374_s30 = sphi %s2502_s30, %s2885_s30  }
  0x18   : > { %2854 = sst [smem:[#allocation24_spill]] %s2382_s19  ;;  %s1745_s20 = sadd.s32 4294967294, %s2386_s1  }
  0x19   : > { %2855 = sst [smem:[#allocation25_spill]] %s2386_s1  ;;  %s2527_s21 = sadd.s32 1, %s2386_s1  }
  0x1a   : > { %2856 = sst [smem:[#allocation26_spill]] %s2527_s21  ;;  %s408_s22 = sadd.s32 1, %s2382_s19 }
  0x1b   : > { %s405_s2 = ssub.s32 %s2386_s1, %s2527_s21  ;;  %p418_p0 = scmp.ne.s32.totalorder %s2382_s19, %s2378_s0 }
  0x1c   : > { %p406_p1 = scmp.eq.s32.totalorder %s405_s2, 0  ;;  %p419_p2 = scmp.eq.s32.totalorder %s2523_s11, 1 }
  0x1d   : > { %p424_p3 = scmp.ne.s32.totalorder %s2378_s0, %s2374_s30  ;;  %p425_p4 = scmp.eq.s32.totalorder %s1745_s20, 1 }
  0x1e   : > { %s2538_s23 = scalar_select %p406_p1, %s2382_s19, %s408_s22  }
  0x1f   : > { %p2540_p5 = por %p419_p2, %p418_p0  ;;  %p2544_p6 = por %p425_p4, %p424_p3 }
  0x20   : > { %2857 = sst [smem:[#allocation27_spill]] %s2538_s23  ;;  %p1746_p7 = scmp.ge.s32.totalorder %s2386_s1, 1 }
  0x21   : > { %s2858_s24 = scalar_select %p2540_p5, 1, 0 }
  0x22   : > { %s2859_s25 = scalar_select %p2544_p6, 1, 0 }
  0x23   : > { %p432_p8 = scmp.lt.s32.totalorder %s2386_s1, 3  ;;  %p2843_p9 = scmp.eq.s32.totalorder %s2523_s11, 0 }
  0x24   : > { %2860 = sst [smem:[#allocation28_spill]] %s2859_s25  ;;  %s2389_s27 = smov [#allocation7]  }
  0x25   : > { %p2551_p10 = pnand %p1746_p7, %p432_p8  ;;  %s460_s28 = sshll.u32 %s2389_s27, 4  ;;  %s461_s28 = int_to_ptr.vmem [resolvable:$true] %s460_s28 }
  0x26   : > { %s2390_s20 = smov [#allocation10]   ;;  %s2391_s2 = smov [#allocation13]  }
  0x27   : > { %s2861_s26 = scalar_select %p2551_p10, 1, 0 }
  0x28   : > { %p1996_p11 = pneg %p2551_p10  ;;  %s486_s22 = sshll.u32 %s2390_s20, 4  ;;  %s487_s22 = int_to_ptr.vmem [resolvable:$true] %s486_s22 }
  0x29   : > { %s512_s23 = sshll.u32 %s2391_s2, 4  ;;  %s2137_s27 = scalar_lea.vmem %s461_s28, 512  ;;  %s513_s23 = int_to_ptr.vmem [resolvable:$true] %s512_s23 }
  0x2a   : > { %p2559_p12 = pnand %p2843_p9, %p1996_p11  ;;  %p2138_p0 = scmp.ne.s32.totalorder %s461_s28, %s2137_s27 }
  0x2b   : > { %p2145_p3 = scmp.lt.s32.totalorder %s461_s28, %s461_s28  ;;  %p2146_p4 = scmp.lt.s32.totalorder %s2137_s27, %s2137_s27 }
  0x2c   : > { %p2565_p13 = pneg %p2559_p12 }
  0x2d   : > { %p2147_p7 = por %p2146_p4, %p2145_p3 }
  0x2e   : > { %p2140_p1 = pnand %p2138_p0, %p2565_p13 }
  0x30   : > { %p2141_p2 = pneg %p2140_p1 }
  0x32   : > { %p2148_p8 = pnand %p2147_p7, %p2141_p2 }
  0x34   : > { %2151 = shalt.err (!%p2148_p8)
}
  0x35   : > { %s2392_s20 = smov 64   ;;  %s2393_s2 = smov 4  }
  0x36   : > { %2002 = dma.hbm_to_vmem [thread:$0]  (!%p2559_p12), %s2822_s4, 512, %s461_s28, [#allocation8], %s2392_s20, %s2392_s20, %s2393_s2  }
  0x37   : > { %s2163_s30 = scalar_lea.vmem %s487_s22, 512  ;;  %p2171_p1 = scmp.lt.s32.totalorder %s487_s22, %s487_s22 }
  0x38   : > { %p2164_p11 = scmp.ne.s32.totalorder %s487_s22, %s2163_s30  ;;  %p2172_p6 = scmp.lt.s32.totalorder %s2163_s30, %s2163_s30 }
  0x3a   : > { %p2166_p9 = pnand %p2164_p11, %p2565_p13  ;;  %p2173_p5 = por %p2172_p6, %p2171_p1 }
  0x3c   : > { %p2167_p0 = pneg %p2166_p9 }
  0x3e   : > { %p2174_p3 = pnand %p2173_p5, %p2167_p0 }
  0x40   : > { %2177 = shalt.err (!%p2174_p3)
}
  0x41   : > { %2008 = dma.hbm_to_vmem [thread:$0]  (!%p2559_p12), %s2824_s6, 512, %s487_s22, [#allocation11], %s2392_s20, %s2392_s20, %s2393_s2  }
  0x42   : > { %s2189_s21 = scalar_lea.vmem %s513_s23, 512  ;;  %p2197_p8 = scmp.lt.s32.totalorder %s513_s23, %s513_s23 }
  0x43   : > { %p2190_p2 = scmp.ne.s32.totalorder %s513_s23, %s2189_s21  ;;  %p2198_p9 = scmp.lt.s32.totalorder %s2189_s21, %s2189_s21 }
  0x45   : > { %p2192_p4 = pnand %p2190_p2, %p2565_p13  ;;  %p2199_p11 = por %p2198_p9, %p2197_p8 }
  0x47   : > { %p2193_p7 = pneg %p2192_p4 }
  0x49   : > { %p2200_p10 = pnand %p2199_p11, %p2193_p7 }
  0x4b   : > { %2203 = shalt.err (!%p2200_p10)
}
  0x4c   : > { %2014 = dma.hbm_to_vmem [thread:$0]  (!%p2559_p12), %s2826_s8, 512, %s513_s23, [#allocation14], %s2392_s20, %s2392_s20, %s2393_s2  }
  0x4d   : > { %s2394_s1 = smov [#allocation4]  }
  0x4e   : > { %s447_s28 = sshll.u32 %s2394_s1, 4  ;;  %s448_s28 = int_to_ptr.vmem [resolvable:$true] %s447_s28 }
  0x4f   : > { %s2215_s22 = scalar_lea.vmem %s448_s28, 32  ;;  %p2223_p1 = scmp.lt.s32.totalorder %s448_s28, %s448_s28 }
  0x50   : > { %p2216_p5 = scmp.ne.s32.totalorder %s448_s28, %s2215_s22  ;;  %p2224_p3 = scmp.lt.s32.totalorder %s2215_s22, %s2215_s22 }
  0x52   : > { %p2218_p6 = pnand %p2216_p5, %p2565_p13  ;;  %p2225_p2 = por %p2224_p3, %p2223_p1 }
  0x54   : > { %p2219_p0 = pneg %p2218_p6 }
  0x56   : > { %p2226_p4 = pnand %p2225_p2, %p2219_p0 }
  0x58   : > { %2229 = shalt.err (!%p2226_p4)
}
  0x59   : > { %s2395_s27 = smov 16   ;;  %s2396_s21 = smov 1  }
  0x5a   : > { %s2864_s3 = sld [smem:[#allocation32_spill]]  ;;  %s2397_s2 = smov [#allocation9]  }
  0x5b   : > { %s473_s30 = sshll.u32 %s2397_s2, 4  ;;  %s2398_s25 = smov [#allocation12]   ;;  %s474_s30 = int_to_ptr.vmem [resolvable:$true] %s473_s30 }
  0x5c   : > { %s499_s1 = sshll.u32 %s2398_s25, 4  ;;  %s2241_s22 = scalar_lea.vmem %s474_s30, 32  ;;  %s500_s1 = int_to_ptr.vmem [resolvable:$true] %s499_s1 }
  0x5d   : > { %p2242_p10 = scmp.ne.s32.totalorder %s474_s30, %s2241_s22  ;;  %p2249_p9 = scmp.lt.s32.totalorder %s474_s30, %s474_s30 }
  0x5e   : > { %p2250_p11 = scmp.lt.s32.totalorder %s2241_s22, %s2241_s22 }
  0x5f   : > { %p2244_p7 = pnand %p2242_p10, %p2565_p13 }
  0x60   : > { %1999 = dma.hbm_to_vmem [thread:$0]  (!%p2559_p12), %s2864_s3, 32, %s448_s28, [#allocation5], %s2395_s27, %s2395_s27, %s2396_s21  }
  0x61   : > { %p2245_p8 = pneg %p2244_p7  ;;  %p2251_p5 = por %p2250_p11, %p2249_p9 }
  0x63   : > { %p2252_p6 = pnand %p2251_p5, %p2245_p8 }
  0x65   : > { %2255 = shalt.err (!%p2252_p6)
}
  0x66   : > { %2005 = dma.hbm_to_vmem [thread:$0]  (!%p2559_p12), %s2823_s5, 32, %s474_s30, [#allocation8], %s2395_s27, %s2395_s27, %s2396_s21  }
  0x67   : > { %s2267_s20 = scalar_lea.vmem %s500_s1, 32  ;;  %p2275_p2 = scmp.lt.s32.totalorder %s500_s1, %s500_s1 }
  0x68   : > { %p2268_p0 = scmp.ne.s32.totalorder %s500_s1, %s2267_s20  ;;  %p2276_p4 = scmp.lt.s32.totalorder %s2267_s20, %s2267_s20 }
  0x6a   : > { %p2270_p1 = pnand %p2268_p0, %p2565_p13  ;;  %p2277_p10 = por %p2276_p4, %p2275_p2 }
  0x6c   : > { %p2271_p3 = pneg %p2270_p1 }
  0x6e   : > { %p2278_p7 = pnand %p2277_p10, %p2271_p3 }
  0x70   : > { %2281 = shalt.err (!%p2278_p7)
}
  0x71   : > { %2011 = dma.hbm_to_vmem [thread:$0]  (!%p2559_p12), %s2825_s7, 32, %s500_s1, [#allocation11], %s2395_s27, %s2395_s27, %s2396_s21  }
  0x72   : > { %s2399_s30 = smov [#allocation15]  }
  0x73   : > { %s526_s22 = sshll.u32 %s2399_s30, 4  ;;  %s527_s22 = int_to_ptr.vmem [resolvable:$true] %s526_s22 }
  0x74   : > { %s2293_s28 = scalar_lea.vmem %s527_s22, 16  ;;  %s2300_s23 = scalar_lea.vmem %s527_s22, 32 }
  0x75   : > { %p2294_p8 = scmp.ne.s32.totalorder %s527_s22, %s2293_s28  ;;  %p2301_p5 = scmp.lt.s32.totalorder %s527_s22, %s527_s22 }
  0x76   : > { %p2302_p6 = scmp.lt.s32.totalorder %s2300_s23, %s2293_s28 }
  0x77   : > { %p2296_p9 = pnand %p2294_p8, %p2565_p13 }
  0x78   : > { %p2303_p0 = por %p2302_p6, %p2301_p5 }
  0x79   : > { %p2297_p11 = pneg %p2296_p9 }
  0x7b   : > { %p2304_p1 = pnand %p2303_p0, %p2297_p11 }
  0x7d   : > { %2307 = shalt.err (!%p2304_p1)
}
  0x7e   : > { %2017 = dma.hbm_to_vmem [thread:$0]  (!%p2559_p12), %s2827_s9, 16, %s527_s22, [#allocation14]  }
  0x7f   : > { %p2865_p3 = scmp.ne.s32.totalorder %s2861_s26, 0 }
  0x80   : > { %p2866_p2 = scmp.eq.s32.totalorder (!%p2865_p3), %s2523_s11, 0 }
  0x81   : > { %570 = sbr.rel (%p2865_p3) target bundleno = 2306 (0x902), region = 88 }
  0x86   : > { %2353 = dma.done.wait (%p2866_p2), [#allocation5], 32   ;;  %p2867_p13 = pmov %p2866_p2 }
  0x87   : > { %p2868_p4 = pmov %p2866_p2 }
  0x88   : > { %2355 = vsyncadd (%p2867_p13), [#allocation5], 4294967264 }
  0x89   : > { %2357 = dma.done.wait (%p2868_p4), [#allocation8], 544   ;;  %p2869_p10 = pmov %p2866_p2 }
  0x8a   : > { %p2870_p7 = pmov %p2866_p2 }
  0x8b   : > { %2359 = vsyncadd (%p2869_p10), [#allocation8], 4294966752 }
  0x8c   : > { %2361 = dma.done.wait (%p2870_p7), [#allocation11], 544   ;;  %p2871_p12 = pmov %p2866_p2 }
  0x8d   : > { %p2872_p8 = pmov %p2866_p2 }
  0x8e   : > { %2363 = vsyncadd (%p2871_p12), [#allocation11], 4294966752 }
  0x8f   : > { %2365 = dma.done.wait (%p2872_p8), [#allocation14], 528   ;;  %p2873_p9 = pmov %p2866_p2 }
  0x90   : > { %p645_p11 = scmp.lt.s32.totalorder %s2523_s11, 1  ;;  %v2400_v0 = vmov 0.0   ;;  %vm2401_vm0 = vmmov 0   ;;  %s2874_s21 = sld [smem:[#allocation31_spill]]  ;;  %vm686_vm1 = vcmask 261120   ;;  %v2088_v7 = vld [vmem:[#allocation7 + $0x8] sm:$0xff]   ;;  %v1042_v63 = vlaneseq }
  0x91   : > { %2367 = vsyncadd (%p2873_p9), [#allocation14], 4294966768  ;;  %1858 = vmatprep.subr.bf16.mxu0 %v2400_v0  ;;  %1866 = vmatprep.subr.bf16.mxu1 %v2400_v0  ;;  %s2875_s28 = sld [smem:[#allocation30_spill]]  ;;  %v2089_v8 = vld [vmem:[#allocation7 + $0x18] sm:$0xff]   ;;  %v2090_v9 = vld [vmem:[#allocation7] sm:$0xff]   ;;  %vm1168_vm2 = vcmask 1043456  }
  0x92   : > { %1862 = vmatprep.mubr.msk.bf16.mxu0 %vm2401_vm0, %v2400_v0  ;;  %1870 = vmatprep.mubr.msk.bf16.mxu1 %vm2401_vm0, %v2400_v0  ;;  %s646_s19 = scalar_select %p645_p11, %s2523_s11, 1  ;;  %v2091_v10 = vld [vmem:[#allocation7 + $0x10] sm:$0xff]   ;;  %v2093_v12 = vld [vmem:[#allocation10] sm:$0xff]   ;;  %v2094_v13 = vld [vmem:[#allocation10 + $0x18] sm:$0xff]   ;;  %vm1140_vm4 = vcmask 64512   ;;  %vm1528_vm5 = vcmask 523264  }
  0x93   : > { %v2092_v11 = vld [vmem:[#allocation10 + $0x8] sm:$0xff]   ;;  %v2095_v14 = vld [vmem:[#allocation10 + $0x10] sm:$0xff]   ;;  %v1773_v22 = vld [vmem:[#allocation9] ss:$0 sm:$0xff]  ;;  %s1044_s3 = sld [smem:[#allocation3 + %s2523_s11]]  ;;  %s1815_s29 = sshll.u32 %s2523_s11, 7 }
  0x94   : > { %s1764_s26 = sshll.u32 %s646_s19, 3  ;;  %v1774_v24 = vld [vmem:[#allocation9 + $0x1] ss:$0 sm:$0xff]  ;;  %v1765_v25 = vld [vmem:[#allocation4] ss:$0 sm:$0xff]  ;;  %s1615_s22 = scalar_lea.hbm %s2836_s18, %s1815_s29 }
  0x95   : > { %v1766_v27 = vld [vmem:[#allocation4 + $0x1] ss:$0 sm:$0xff]  ;;  %v1781_v47 = vld [vmem:[#allocation12] ss:$0 sm:$0xff]  ;;  %v1782_v51 = vld [vmem:[#allocation12 + $0x1] ss:$0 sm:$0xff] }
  0x96   : > { %v2084_v1 = vld [vmem:[%s2874_s21 + $0x8] sm:$0xff]   ;;  %v2085_v2 = vld [vmem:[%s2874_s21 + $0x18] sm:$0xff]   ;;  %v2086_v3 = vld [vmem:[%s2874_s21] sm:$0xff]   ;;  %p2877_p6 = scmp.ne.s32.totalorder %s2858_s24, 0  ;;  %s2403_s19 = smov [#allocation16]  }
  0x97   : > { %s648_s23 = scalar_lea.vmem %s2875_s28, %s1764_s26  ;;  %1859 = vmatpush3.bf16.msra.mxu0 %v2084_v1  ;;  %1867 = vmatpush3.bf16.msra.mxu1 %v2085_v2  ;;  %v2087_v4 = vld [vmem:[%s2874_s21 + $0x10] sm:$0xff]   ;;  %v1043_v1 = vand.u32 127, %v1042_v63 }
  0x98   : > { %1860 = vmatprep.subr.bf16.mxu0 %v2400_v0  ;;  %1868 = vmatprep.subr.bf16.mxu1 %v2400_v0  ;;  %v2670_v5 = vld [vmem:[%s648_s23] sm:$0xff]  ;;  %s642_s23 = sand.u32 1, %s2378_s0  }
  0x99   : > { %v651_v6 = vpack.c.bf16 %v2670_v5, %v2670_v5  ;;  %v1045_v2 = vstv %s1044_s3  ;;  %s2876_s3 = sld [smem:[#allocation33_spill]]  ;;  %s1763_s20 = sshll.u32 %s642_s23, 3 }
  0x9a   : > { %vm1046_vm3 = vcmp.lt.s32.totalorder %v1043_v1, %v1045_v2  ;;  %s644_s27 = scalar_lea.vmem [#allocation16], %s1763_s20  ;;  %s1604_s28 = scalar_lea.sflag [#allocation6], %s642_s23 }
  0x9b   : > { %1861 = vmatpush3.bf16.msra.mxu0 %v2086_v3  ;;  %1869 = vmatpush3.bf16.msra.mxu1 %v2087_v4  ;;  %v2402_v3 = vmov -1e+09   ;;  %s1617_s1 = sshll.u32 %s644_s27, 4  ;;  %s1618_s1 = int_to_ptr.vmem [resolvable:$true] %s1617_s1 }
  0x9c   : > { %1874 = vmatprep.subr.bf16.mxu0 %v2400_v0  ;;  %1882 = vmatprep.subr.bf16.mxu1 %v2400_v0  ;;  %v1047_v4 = vsel %vm1046_vm3, 0.0, %v2402_v3  ;;  %s2308_s2 = scalar_lea.vmem %s1618_s1, 128 }
  0x9d   : > { %p2309_p5 = scmp.ne.s32.totalorder %s1618_s1, %s2308_s2 }
  0x9e   : > { %1863 = vmatmul.mubr.msk.bf16.vlgmr.msra.gmra.mxu0 %vm686_vm1, %v651_v6  ;;  %1871 = vmatmul.mubr.msk.bf16.vlgmr.msra.gmra.mxu1 %vm686_vm1, %v651_v6 }
  0x9f   : > { %1875 = vmatpush3.bf16.msra.mxu0 %v2088_v7  ;;  %1883 = vmatpush3.bf16.msra.mxu1 %v2089_v8  ;;  %p2310_p0 = pnand %p2309_p5, %p2877_p6 }
  0xa0   : > { %1876 = vmatprep.subr.bf16.mxu0 %v2400_v0  ;;  %1884 = vmatprep.subr.bf16.mxu1 %v2400_v0 }
  0xa1   : > { %1878 = vmatprep.mubr.msk.bf16.mxu0 %vm2401_vm0, %v2400_v0  ;;  %1886 = vmatprep.mubr.msk.bf16.mxu1 %vm2401_vm0, %v2400_v0  ;;  %p2311_p1 = pneg %p2310_p0 }
  0xa3   : > { %1877 = vmatpush3.bf16.msra.mxu0 %v2090_v9  ;;  %1885 = vmatpush3.bf16.msra.mxu1 %v2091_v10 }
  0xa4   : > { %1890 = vmatprep.subr.bf16.mxu0 %v2400_v0  ;;  %1898 = vmatprep.subr.bf16.mxu1 %v2400_v0 }
  0xa6   : > { %1879 = vmatmul.mubr.msk.bf16.vlgmr.msra.gmra.mxu0 %vm686_vm1, %v651_v6  ;;  %1887 = vmatmul.mubr.msk.bf16.vlgmr.msra.gmra.mxu1 %vm686_vm1, %v651_v6 }
  0xa7   : > { %1894 = vmatprep.mubr.msk.bf16.mxu0 %vm2401_vm0, %v2400_v0  ;;  %1902 = vmatprep.mubr.msk.bf16.mxu1 %vm2401_vm0, %v2400_v0 }
  0xa8   : > { %1891 = vmatpush3.bf16.msra.mxu0 %v2092_v11  ;;  %1899 = vmatpush3.bf16.msra.mxu1 %v2094_v13 }
  0xa9   : > { %1892 = vmatprep.subr.bf16.mxu0 %v2400_v0  ;;  %1900 = vmatprep.subr.bf16.mxu1 %v2400_v0 }
  0xac   : > { %1893 = vmatpush3.bf16.msra.mxu0 %v2093_v12  ;;  %1901 = vmatpush3.bf16.msra.mxu1 %v2095_v14 }
  0xad   : > { %1906 = vmatprep.subr.bf16.mxu0 %v2400_v0  ;;  %1912 = vmatprep.subr.bf16.mxu1 %v2400_v0 }
  0xaf   : > { %1895 = vmatmul.mubr.msk.bf16.vlgmr.msra.gmra.mxu0 %vm686_vm1, %v651_v6  ;;  %1903 = vmatmul.mubr.msk.bf16.vlgmr.msra.gmra.mxu1 %vm686_vm1, %v651_v6 }
  0xb0   : > { %1908 = vmatprep.mubr.msk.bf16.mxu0 %vm2401_vm0, %v2400_v0  ;;  %1914 = vmatprep.mubr.msk.bf16.mxu1 %vm2401_vm0, %v2400_v0 }
 0x15e   : > { %v724_v15 = vpop.f32.mrf.mxu0  ;;  %v776_v16 = vpop.f32.mrf.mxu1 }
 0x15f   : > { %v725_v32 = vadd.f32 %v1765_v25, %v724_v15  ;;  %v777_v35 = vadd.f32 %v1766_v27, %v776_v16 }
 0x160   : > { %v1864_v17 = vpop.f32.mrf.mxu0  ;;  %v1872_v18 = vpop.f32.mrf.mxu1 }
 0x161   : > { %v782_v42 = vmul.f32 0.17677669, %v725_v32  ;;  %v783_v44 = vmul.f32 0.17677669, %v777_v35  ;;  %v2096_v32 = vld [vmem:[#allocation13 + $0x8] sm:$0xff]  }
 0x162   : > { %v727_v19 = vpop.f32.mrf.mxu0  ;;  %v779_v20 = vpop.f32.mrf.mxu1 }
 0x163   : > { %v1036_v45 = vpack.c.bf16 %v782_v42, %v782_v42  ;;  %v1037_v46 = vpack.c.bf16 %v783_v44, %v783_v44 }
 0x164   : > { %v1865_v21 = vpop.f32.mrf.mxu0  ;;  %v1873_v23 = vpop.f32.mrf.mxu1 }
 0x166   : > { %v852_v26 = vpop.f32.mrf.mxu0  ;;  %v904_v29 = vpop.f32.mrf.mxu1 }
 0x167   : > { %v853_v28 = vadd.f32 %v1773_v22, %v852_v26  ;;  %v905_v30 = vadd.f32 %v1774_v24, %v904_v29 }
 0x168   : > { %v1880_v31 = vpop.f32.mrf.mxu0  ;;  %v1888_v34 = vpop.f32.mrf.mxu1 }
 0x169   : > { %v1038_v33 = vpack.c.bf16 %v853_v28, %v853_v28  ;;  %v1039_v36 = vpack.c.bf16 %v905_v30, %v905_v30 }
 0x16a   : > { %v855_v37 = vpop.f32.mrf.mxu0  ;;  %v907_v39 = vpop.f32.mrf.mxu1 }
 0x16b   : > { %v1052_v38 = vsel %vm686_vm1, %v1038_v33, 0  ;;  %v1098_v40 = vsel %vm686_vm1, %v1039_v36, 0  ;;  %v2097_v37 = vld [vmem:[#allocation13] sm:$0xff]   ;;  %v2099_v39 = vld [vmem:[#allocation13 + $0x10] sm:$0xff]  }
 0x16c   : > { %v1881_v41 = vpop.f32.mrf.mxu0  ;;  %1907 = vmatpush3.bf16.xpose.msra.mxu0 %v1052_v38  ;;  %v1889_v43 = vpop.f32.mrf.mxu1  ;;  %1913 = vmatpush3.bf16.xpose.msra.mxu1 %v1098_v40  ;;  %v2098_v38 = vld [vmem:[#allocation13 + $0x18] sm:$0xff]  }
 0x16d   : > { %1918 = vmatprep.subr.bf16.mxu0 %v2400_v0  ;;  %1924 = vmatprep.subr.bf16.mxu1 %v2400_v0 }
 0x16f   : > { %v978_v48 = vpop.f32.mrf.mxu0  ;;  %v1030_v54 = vpop.f32.mrf.mxu1 }
 0x170   : > { %v979_v49 = vadd.f32 %v1781_v47, %v978_v48  ;;  %v1031_v56 = vadd.f32 %v1782_v51, %v1030_v54 }
 0x171   : > { %v1896_v50 = vpop.f32.mrf.mxu0  ;;  %v1904_v58 = vpop.f32.mrf.mxu1 }
 0x172   : > { %v1040_v52 = vpack.c.bf16 %v979_v49, %v979_v49  ;;  %v1041_v59 = vpack.c.bf16 %v1031_v56, %v1031_v56  ;;  %v1799_v56 = vld [vmem:[#allocation15] ss:$0 sm:$0xff] }
 0x173   : > { %1909 = vmatmul.mubr.msk.bf16.vlgmr.msra.gmra.mxu0 %vm686_vm1, %v1036_v45  ;;  %1915 = vmatmul.mubr.msk.bf16.vlgmr.msra.gmra.mxu1 %vm686_vm1, %v1037_v46  ;;  %v981_v53 = vpop.f32.mrf.mxu0  ;;  %v1033_v60 = vpop.f32.mrf.mxu1 }
 0x174   : > { %1920 = vmatprep.mubr.msk.bf16.mxu0 %vm2401_vm0, %v2400_v0  ;;  %1926 = vmatprep.mubr.msk.bf16.mxu1 %vm2401_vm0, %v2400_v0  ;;  %v1170_v55 = vsel %vm1168_vm2, %v1040_v52, 0  ;;  %v1216_v61 = vsel %vm1168_vm2, %v1041_v59, 0 }
 0x175   : > { %v1897_v57 = vpop.f32.mrf.mxu0  ;;  %1919 = vmatpush3.bf16.msra.mxu0 %v1170_v55  ;;  %v1905_v62 = vpop.f32.mrf.mxu1  ;;  %1925 = vmatpush3.bf16.msra.mxu1 %v1216_v61 }
 0x176   : > { %1930 = vmatprep.subr.bf16.mxu0 %v2400_v0  ;;  %1938 = vmatprep.subr.bf16.mxu1 %v2400_v0 }
 0x233   : > { %v1088_v6 = vpop.f32.mrf.mxu0  ;;  %v1134_v8 = vpop.f32.mrf.mxu1 }
 0x234   : > { %v1089_v7 = vadd.f32 %v1088_v6, %v1047_v4  ;;  %v1135_v10 = vadd.f32 %v1134_v8, %v1047_v4  ;;  %v2100_v8 = vld [vmem:[%s2830_s12 + $0x8] sm:$0xff]  }
 0x235   : > { %v1910_v9 = vpop.f32.mrf.mxu0  ;;  %v1916_v11 = vpop.f32.mrf.mxu1 }
 0x236   : > { %v1141_v12 = vsel %vm1140_vm4, %v1089_v7, -inf  ;;  %v1144_v17 = vsel %vm1140_vm4, %v1135_v10, -inf  ;;  %v2101_v9 = vld [vmem:[%s2830_s12] sm:$0xff]  }
 0x237   : > { %1142 = vmax.xlane.f32.xlu0 %v1141_v12  ;;  %v1091_v13 = vpop.f32.mrf.mxu0  ;;  %v1137_v14 = vpop.f32.mrf.mxu1 }
 0x239   : > { %v1911_v15 = vpop.f32.mrf.mxu0  ;;  %v1917_v16 = vpop.f32.mrf.mxu1 }
 0x23a   : > { %v1800_v15 = vld [vmem:[%s2828_s10] ss:$0 sm:$0xff] }
 0x23b   : > { %1145 = vmax.xlane.f32.xlu0 %v1144_v17  ;;  %v1801_v17 = vld [vmem:[%s2876_s3] ss:$0 sm:$0xff]  ;;  %s2312_s3 = sshll.u32 %s2403_s19, 4  ;;  %s2313_s3 = int_to_ptr.vmem [resolvable:$false] %s2312_s3 }
 0x23c   : > { %s2314_s11 = scalar_lea.vmem %s2313_s3, 256  ;;  %p2315_p3 = scmp.lt.s32.totalorder %s1618_s1, %s2313_s3 }
 0x23d   : > { %p2316_p2 = scmp.lt.s32.totalorder %s2314_s11, %s2308_s2 }
 0x23f   : > { %p2317_p13 = por %p2316_p2, %p2315_p3 }
 0x241   : > { %p2318_p4 = pnand %p2317_p13, %p2311_p1 }
 0x2c0   : > { %v1143_v18 = vpop.xlane.xlu0 %1142 }
 0x2c1   : > { %v1147_v19 = vsub.f32 %v1089_v7, %v1143_v18 }
 0x2c3   : > { %v1149_v20 = vmul.f32 1.442695, %v1147_v19 }
 0x2c4   : > { %v1146_v21 = vpop.xlane.xlu0 %1145 }
 0x2c5   : > { %2106 = vpow2.f32 %v1149_v20  ;;  %v1148_v22 = vsub.f32 %v1135_v10, %v1146_v21  ;;  %v2103_v10 = vld [vmem:[%s2832_s14 + $0x10] sm:$0xff]   ;;  %v2104_v21 = vld [vmem:[%s2832_s14 + $0x8] sm:$0xff]  }
 0x2c7   : > { %v1151_v23 = vmul.f32 1.442695, %v1148_v22  ;;  %v2105_v22 = vld [vmem:[%s2832_s14] sm:$0xff]  }
 0x2c9   : > { %2108 = vpow2.f32 %v1151_v23  ;;  %v1802_v23 = vld [vmem:[%s2831_s13] ss:$0 sm:$0xff] }
 0x2d2   : > { %v2107_v24 = vpop.eup %2106 }
 0x2d3   : > { %v1153_v25 = vsel %vm1140_vm4, %v2107_v24, 0.0 }
 0x2d4   : > { %1154 = vadd.xlane.f32.xlu1 %v1153_v25 }
 0x2d6   : > { %v2109_v26 = vpop.eup %2108 }
 0x2d7   : > { %v1156_v27 = vsel %vm1140_vm4, %v2109_v26, 0.0 }
 0x2d8   : > { %1157 = vadd.xlane.f32.xlu1 %v1156_v27 }
 0x35d   : > { %v1155_v28 = vpop.xlane.xlu1 %1154 }
 0x35e   : > { %2110 = vrcp.f32 %v1155_v28 }
 0x361   : > { %v1158_v29 = vpop.xlane.xlu1 %1157 }
 0x362   : > { %2112 = vrcp.f32 %v1158_v29 }
 0x36b   : > { %v2111_v30 = vpop.eup %2110 }
 0x36c   : > { %v1161_v31 = vmul.f32 %v2111_v30, %v2107_v24 }
 0x36e   : > { %v1163_v33 = vpack.c.bf16 %v1161_v31, %v1161_v31 }
 0x36f   : > { %v2113_v34 = vpop.eup %2112 }
 0x370   : > { %1921 = vmatmul.mubr.msk.bf16.vlgmr.msra.gmra.mxu0 %vm1140_vm4, %v1163_v33  ;;  %v1162_v35 = vmul.f32 %v2113_v34, %v2109_v26 }
 0x371   : > { %1931 = vmatpush3.bf16.msra.mxu0 %v2096_v32  ;;  %1934 = vmatprep.mubr.msk.bf16.mxu0 %vm2401_vm0, %v2400_v0 }
 0x372   : > { %v1164_v36 = vpack.c.bf16 %v1162_v35, %v1162_v35  ;;  %1932 = vmatprep.subr.bf16.mxu0 %v2400_v0 }
 0x374   : > { %1927 = vmatmul.mubr.msk.bf16.vlgmr.msra.gmra.mxu1 %vm1140_vm4, %v1164_v36 }
 0x375   : > { %1942 = vmatprep.mubr.msk.bf16.mxu1 %vm2401_vm0, %v2400_v0  ;;  %1933 = vmatpush3.bf16.msra.mxu0 %v2097_v37 }
 0x376   : > { %1939 = vmatpush3.bf16.msra.mxu1 %v2098_v38  ;;  %1946 = vmatprep.subr.bf16.mxu0 %v2400_v0 }
 0x377   : > { %1940 = vmatprep.subr.bf16.mxu1 %v2400_v0 }
 0x37a   : > { %1941 = vmatpush3.bf16.msra.mxu1 %v2099_v39 }
 0x37b   : > { %1954 = vmatprep.subr.bf16.mxu1 %v2400_v0 }
 0x430   : > { %v1206_v40 = vpop.f32.mrf.mxu0 }
 0x431   : > { %v1258_v41 = vpack.c.bf16 %v1206_v40, %v1206_v40 }
 0x432   : > { %v1922_v42 = vpop.f32.mrf.mxu0 }
 0x433   : > { %1935 = vmatmul.mubr.msk.bf16.vlgmr.msra.gmra.mxu0 %vm686_vm1, %v1258_v41 }
 0x434   : > { %v1209_v43 = vpop.f32.mrf.mxu0  ;;  %v1252_v44 = vpop.f32.mrf.mxu1  ;;  %1950 = vmatprep.mubr.msk.bf16.mxu0 %vm2401_vm0, %v2400_v0  ;;  %1947 = vmatpush3.bf16.msra.mxu0 %v2100_v8 }
 0x435   : > { %v1259_v45 = vpack.c.bf16 %v1252_v44, %v1252_v44  ;;  %1948 = vmatprep.subr.bf16.mxu0 %v2400_v0 }
 0x436   : > { %v1923_v46 = vpop.f32.mrf.mxu0  ;;  %v1928_v47 = vpop.f32.mrf.mxu1 }
 0x437   : > { %1943 = vmatmul.mubr.msk.bf16.vlgmr.msra.gmra.mxu1 %vm686_vm1, %v1259_v45  ;;  %v1812_v47 = vld [vmem:[%s2834_s16] ss:$0 sm:$0xff] }
 0x438   : > { %v1255_v48 = vpop.f32.mrf.mxu1  ;;  %1962 = vmatprep.mubr.msk.bf16.mxu1 %vm2401_vm0, %v2400_v0  ;;  %1949 = vmatpush3.bf16.msra.mxu0 %v2101_v9 }
 0x43a   : > { %v1929_v49 = vpop.f32.mrf.mxu1 }
 0x43b   : > { %v1813_v49 = vld [vmem:[%s2835_s17] ss:$0 sm:$0xff] }
 0x4f3   : > { %v1317_v50 = vpop.f32.mrf.mxu0 }
 0x4f4   : > { %v1378_v54 = vsel %vm686_vm1, %v1317_v50, 0.0 }
 0x4f5   : > { %v1936_v51 = vpop.f32.mrf.mxu0 }
 0x4f7   : > { %v1320_v52 = vpop.f32.mrf.mxu0  ;;  %v1372_v53 = vpop.f32.mrf.mxu1 }
 0x4f8   : > { %v1379_v55 = vsel %vm686_vm1, %v1372_v53, 0.0 }
 0x4f9   : > { %v1380_v57 = vadd.f32 %v1379_v55, %v1378_v54  ;;  %v1937_v58 = vpop.f32.mrf.mxu0  ;;  %v1944_v59 = vpop.f32.mrf.mxu1 }
 0x4fb   : > { %v1388_v60 = vadd.f32 %v1799_v56, %v1380_v57  ;;  %v1375_v61 = vpop.f32.mrf.mxu1 }
 0x4fd   : > { %v1945_v62 = vpop.f32.mrf.mxu1  ;;  %v1389_v63 = vadd.f32 %v1388_v60, %v2670_v5  ;;  %v2102_v5 = vld [vmem:[%s2832_s14 + $0x18] sm:$0xff]  }
 0x4fe   : > { %1955 = vmatpush3.bf16.msra.mxu1 %v2102_v5 }
 0x4ff   : > { %v1392_v1 = vsel %vm686_vm1, %v1389_v63, 0.0  ;;  %1956 = vmatprep.subr.bf16.mxu1 %v2400_v0 }
 0x500   : > { %1393 = vadd.xlane.f32.xlu0 %v1392_v1 }
 0x502   : > { %1957 = vmatpush3.bf16.msra.mxu1 %v2103_v10 }
 0x503   : > { %1958 = vmatprep.subr.bf16.mxu1 %v2400_v0 }
 0x506   : > { %1959 = vmatpush3.bf16.msra.mxu1 %v2104_v21 }
 0x507   : > { %1960 = vmatprep.subr.bf16.mxu1 %v2400_v0  ;;  %v1806_v0 = vld [vmem:[%s2833_s15] ss:$0 sm:$0xff] }
 0x50a   : > { %1961 = vmatpush3.bf16.msra.mxu1 %v2105_v22 }
 0x589   : > { %v1394_v2 = vpop.xlane.xlu0 %1393 }
 0x58a   : > { %v1396_v3 = vmul.f32 0.03125, %v1394_v2 }
 0x58c   : > { %v1397_v4 = vsub.f32 %v1389_v63, %v1396_v3 }
 0x58e   : > { %v1398_v6 = vmul.f32 %v1397_v4, %v1397_v4 }
 0x590   : > { %v1399_v7 = vsel %vm686_vm1, %v1398_v6, 0.0 }
 0x591   : > { %1400 = vadd.xlane.f32.xlu1 %v1399_v7 }
 0x61a   : > { %v1401_v11 = vpop.xlane.xlu1 %1400 }
 0x61b   : > { %v1402_v12 = vmul.f32 0.03125, %v1401_v11 }
 0x61d   : > { %v1403_v13 = vadd.f32 1e-05, %v1402_v12 }
 0x61f   : > { %2114 = vrsqrt.f32 %v1403_v13 }
 0x62c   : > { %v2115_v14 = vpop.eup %2114 }
 0x62d   : > { %v1405_v16 = vmul.f32 %v2115_v14, %v1397_v4 }
 0x62f   : > { %v1412_v18 = vmul.f32 %v1800_v15, %v1405_v16 }
 0x631   : > { %v1419_v19 = vadd.f32 %v1801_v17, %v1412_v18 }
 0x633   : > { %v1420_v20 = vpack.c.bf16 %v1419_v19, %v1419_v19 }
 0x635   : > { %1951 = vmatmul.mubr.msk.bf16.vlgmr.msra.gmra.mxu0 %vm686_vm1, %v1420_v20 }
 0x6f5   : > { %v1481_v24 = vpop.f32.mrf.mxu0 }
 0x6f6   : > { %v1482_v25 = vadd.f32 %v1802_v23, %v1481_v24 }
 0x6f7   : > { %v1952_v26 = vpop.f32.mrf.mxu0 }
 0x6f8   : > { %v1487_v27 = vmax.f32 %v1482_v25, 0.0 }
 0x6f9   : > { %v1484_v28 = vpop.f32.mrf.mxu0 }
 0x6fa   : > { %v1488_v29 = vpack.c.bf16 %v1487_v27, %v1487_v27 }
 0x6fb   : > { %v1953_v30 = vpop.f32.mrf.mxu0 }
 0x6fc   : > { %1963 = vmatmul.mubr.msk.bf16.vlgmr.msra.gmra.mxu1 %vm1528_vm5, %v1488_v29 }
 0x7bc   : > { %v1566_v31 = vpop.f32.mrf.mxu1 }
 0x7bd   : > { %v1567_v32 = vadd.f32 %v1806_v0, %v1566_v31 }
 0x7be   : > { %v1964_v33 = vpop.f32.mrf.mxu1 }
 0x7bf   : > { %v1572_v34 = vadd.f32 %v1567_v32, %v1419_v19 }
 0x7c0   : > { %v1569_v35 = vpop.f32.mrf.mxu1 }
 0x7c1   : > { %v1575_v36 = vsel %vm686_vm1, %v1572_v34, 0.0 }
 0x7c2   : > { %1576 = vadd.xlane.f32.xlu0 %v1575_v36  ;;  %v1965_v37 = vpop.f32.mrf.mxu1 }
 0x84b   : > { %v1577_v38 = vpop.xlane.xlu0 %1576 }
 0x84c   : > { %v1578_v39 = vmul.f32 0.03125, %v1577_v38 }
 0x84e   : > { %v1579_v40 = vsub.f32 %v1572_v34, %v1578_v39 }
 0x850   : > { %v1580_v41 = vmul.f32 %v1579_v40, %v1579_v40 }
 0x852   : > { %v1581_v42 = vsel %vm686_vm1, %v1580_v41, 0.0 }
 0x853   : > { %1582 = vadd.xlane.f32.xlu1 %v1581_v42 }
 0x8dc   : > { %v1583_v43 = vpop.xlane.xlu1 %1582 }
 0x8dd   : > { %v1584_v44 = vmul.f32 0.03125, %v1583_v43 }
 0x8df   : > { %v1585_v45 = vadd.f32 1e-05, %v1584_v44 }
 0x8e1   : > { %2116 = vrsqrt.f32 %v1585_v45 }
 0x8ee   : > { %v2117_v46 = vpop.eup %2116 }
 0x8ef   : > { %v1587_v48 = vmul.f32 %v2117_v46, %v1579_v40 }
 0x8f1   : > { %v1594_v50 = vmul.f32 %v1812_v47, %v1587_v48 }
 0x8f3   : > { %v1601_v51 = vadd.f32 %v1813_v49, %v1594_v50 }
 0x8f5   : > { %1602 = vst.msk [vmem:[%s644_s27] sm:$0xff] %vm686_vm1, %v1601_v51 }
 0x8f6   : > { %2321 = shalt.err (!%p2318_p4)
}
 0x8f7   : > { %s2322_s20 = scalar_lea.hbm %s1615_s22, 128  ;;  %s2326_s29 = scalar_lea.hbm %s2836_s18, 256 }
 0x8f8   : > { %p2323_p10 = scmp.ne.s32.totalorder %s1615_s22, %s2322_s20  ;;  %p2327_p8 = scmp.lt.s32.totalorder %s1615_s22, %s2836_s18 }
 0x8f9   : > { %p2328_p9 = scmp.lt.s32.totalorder %s2326_s29, %s2322_s20 }
 0x8fa   : > { %p2324_p7 = pnand %p2323_p10, %p2877_p6 }
 0x8fb   : > { %p2329_p11 = por %p2328_p9, %p2327_p8 }
 0x8fc   : > { %p2325_p12 = pneg %p2324_p7 }
 0x8fe   : > { %p2330_p5 = pnand %p2329_p11, %p2325_p12 }
 0x900   : > { %2333 = shalt.err (!%p2330_p5)
}
 0x901   : > { %1994 = dma.vmem_to_hbm [thread:$0]  (%p2877_p6), %s1618_s1, 128, %s1615_s22, %s1604_s28  }
 0x902 PF: > { %s2878_s30 = sld [smem:[#allocation25_spill]] }
 0x903   : > { %s2879_s2 = sld [smem:[#allocation23_spill]] }
 0x904   : > { %s2880_s19 = sld [smem:[#allocation28_spill]] }
 0x908   : > { %p2036_p0 = scmp.ge.s32.totalorder %s2878_s30, 2 }
 0x909   : > { %s1629_s3 = sand.u32 1, %s2879_s2  }
 0x90a   : > { %p2881_p1 = scmp.ne.s32.totalorder %s2880_s19, 0  ;;  %s1630_s11 = scalar_lea.sflag [#allocation6], %s1629_s3 }
 0x90c   : > { %p2019_p3 = pnand %p2036_p0, %p2881_p1 }
 0x90e   : > { %p2020_p2 = pneg %p2019_p3 }
 0x910   : > { %2369 = dma.done.wait (%p2020_p2), %s1630_s11, 128  }
 0x911   : > { %2371 = vsyncadd (%p2020_p2), %s1630_s11, 4294967168  ;;  %s2882_s1 = sld [smem:[#allocation26_spill]]  ;;  %s2885_s30 = smov %s2378_s0 }
 0x912   : > { %s2883_s20 = sld [smem:[#allocation24_spill]] }
 0x913   : > { %s2884_s19 = sld [smem:[#allocation27_spill]] }
 0x917   : > { %p36_p13 = scmp.ge.s32.totalorder %s2882_s1, 4  }
 0x918   : > { %s2886_s0 = smov %s2883_s20 }
 0x919   :  { %38 = sbr.rel (!%p36_p13) target bundleno = 23 (0x17), region = 152 }
 0x91e   :  { %1635 = vsyncpa [#allocation5], 1 }
 0x91f   :  { %1637 = vsyncpa [#allocation5 + $0x1], 1 }
 0x920   :  { %1638 = vsyncpa [#allocation8], 1 }
 0x921   :  { %1639 = vsyncpa [#allocation11], 1 }
 0x922   :  { %1640 = vsyncpa [#allocation14], 1 }
 0x923   :  { %1641 = vsyncpa [#allocation6], 1 }
 0x924   :  { %1643 = vsyncpa [#allocation6 + $0x1], 1 }

</bundles_post_ra>
